<compile_context>
chip_gen: v5e
topology: v5e:2x2
jax: 0.10.0
libtpu: 0.0.40
codegen_flags: <defaults>
</compile_context>

<pallas_src>
import functools

import jax
import jax.numpy as jnp
from jax.experimental import pallas as pl
from jax.experimental.pallas import tpu as pltpu


EDGE_TYPES = [
    ('post', 'has_comment', 'comment'),
    ('comment', 'authored_by', 'user'),
    ('post', 'self_loop', 'post'),
    ('comment', 'self_loop', 'comment'),
    ('user', 'self_loop', 'user'),
]

NODE_TYPES = ['post', 'comment', 'user']

LANE = 128
SUB = 8


def _round_up(x, m):
    return (x + m - 1) // m * m


# ---------------------------------------------------------------------------
# Fused HeteroConv layer kernel
# ---------------------------------------------------------------------------
def _hetero_layer_kernel(x_ref, a_ref, w_ref, b_ref, m_ref, invc_ref,
                         o_ref, acc_ref, *, apply_relu):
    """grid = (dst-node tiles [parallel], relations [arbitrary/reduction]).

    x_ref    [N_pad, C_pad]      bf16  node-feature slab, VMEM-resident
    a_ref    [1, TN, N_pad]      bf16  row-normalized adjacency tile (global idx)
    w_ref    [1, 2*C_pad, H_pad] bf16  [W_l ; W_r] stacked along K
    b_ref    [1, 1, H_pad]       f32   lin_l bias
    m_ref    [1, TN, 1]          f32   dst-node-type row mask for this relation
    invc_ref [TN, 1]             f32   1 / (#relations targeting this node type)
    o_ref    [TN, H_pad]               lane-dense output tile
    acc_ref  [TN, H_pad]         f32   cross-relation accumulator scratch
    """
    r = pl.program_id(1)

    @pl.when(r == 0)
    def _():
        acc_ref[...] = jnp.zeros_like(acc_ref)

    tn = o_ref.shape[0]
    row0 = pl.multiple_of(pl.program_id(0) * tn, tn)

    x = x_ref[...]                                    # [N_pad, C_pad] bf16
    x_dst = x_ref[pl.ds(row0, tn), :]                 # [TN, C_pad]    bf16

    # mean-neighbor aggregation (rows of non-dst / isolated nodes are zero)
    agg = jnp.dot(a_ref[0], x, preferred_element_type=jnp.float32)  # [TN, C_pad]

    # neighbor + self projection as one K-stacked MXU matmul
    lhs = jnp.concatenate([agg.astype(x_dst.dtype), x_dst], axis=-1)  # [TN, 2*C_pad]
    proj = jnp.dot(lhs, w_ref[0], preferred_element_type=jnp.float32)  # [TN, H_pad]

    # bias + self term are only valid on this relation's dst-node-type rows
    acc_ref[...] += m_ref[0] * (proj + b_ref[0])

    @pl.when(r == pl.num_programs(1) - 1)
    def _():
        res = acc_ref[...] * invc_ref[...]            # HeteroConv aggr='mean'
        if apply_relu:
            res = jnp.maximum(res, 0.0)
        o_ref[...] = res.astype(o_ref.dtype)


def hetero_layer(x_slab, a_stack, w_stack, b_stack, mask_stack, inv_cnt,
                 *, apply_relu, out_dtype, tile_n=None):
    """One fused HeteroConv(SAGEConv) layer over all relations."""
    n_rel, n_pad, _ = a_stack.shape
    c_pad = x_slab.shape[1]
    h_pad = w_stack.shape[2]
    if tile_n is None:
        tile_n = n_pad if n_pad <= 512 else 512
    assert n_pad % tile_n == 0, "caller must pad node count to the dst tile"

    kernel = functools.partial(_hetero_layer_kernel, apply_relu=apply_relu)
    return pl.pallas_call(
        kernel,
        out_shape=jax.ShapeDtypeStruct((n_pad, h_pad), out_dtype),
        grid_spec=pltpu.PrefetchScalarGridSpec(
            num_scalar_prefetch=0,
            grid=(pl.cdiv(n_pad, tile_n), n_rel),
            in_specs=[
                pl.BlockSpec((n_pad, c_pad), lambda i, r: (0, 0)),          # X resident
                pl.BlockSpec((1, tile_n, n_pad), lambda i, r: (r, i, 0)),   # A
                pl.BlockSpec((1, 2 * c_pad, h_pad), lambda i, r: (r, 0, 0)),  # [Wl;Wr]
                pl.BlockSpec((1, 1, h_pad), lambda i, r: (r, 0, 0)),        # bias
                pl.BlockSpec((1, tile_n, 1), lambda i, r: (r, i, 0)),       # dst mask
                pl.BlockSpec((tile_n, 1), lambda i, r: (i, 0)),             # 1/count
            ],
            out_specs=pl.BlockSpec((tile_n, h_pad), lambda i, r: (i, 0)),
            scratch_shapes=[pltpu.VMEM((tile_n, h_pad), jnp.float32)],
        ),
        compiler_params=pltpu.CompilerParams(
            dimension_semantics=("parallel", "arbitrary"),
            vmem_limit_bytes=32 * 1024 * 1024,
        ),
    )(x_slab, a_stack, w_stack, b_stack, mask_stack, inv_cnt)


def hetero_gnn_forward(x_slab, a_stack, masks, inv_cnt, w1, b1, w2, b2):
    # conv1 -> relu (fused in-kernel) -> conv2
    h = hetero_layer(x_slab, a_stack, w1, b1, masks, inv_cnt,
                     apply_relu=True, out_dtype=jnp.bfloat16)
    h = hetero_layer(h, a_stack, w2, b2, masks, inv_cnt,
                     apply_relu=False, out_dtype=jnp.float32)
    return h


# ---------------------------------------------------------------------------
# Plain-JAX glue: packing features / adjacency / params into padded stacks
# ---------------------------------------------------------------------------
def build_global_adj(edge_index, src_off, dst_off, n_pad):
    """Dense row-normalized adjacency [N_pad, N_pad] in global node indices."""
    src = edge_index[0] + src_off
    dst = edge_index[1] + dst_off
    a = jnp.zeros((n_pad, n_pad), jnp.float32).at[dst, src].add(1.0)
    deg = a.sum(axis=1, keepdims=True)
    return a / jnp.maximum(deg, 1.0)          # zero-degree rows stay zero


def pack_features(x_dict, offsets, n_pad, c_pad, dtype=jnp.bfloat16):
    slab = jnp.zeros((n_pad, c_pad), jnp.float32)
    for t in NODE_TYPES:
        x = x_dict[t]
        slab = slab.at[offsets[t]:offsets[t] + x.shape[0], :x.shape[1]].set(x)
    return slab.astype(dtype)


def pack_layer_params(params, edge_types, c_pad, h_pad, hidden):
    w_list, b_list = [], []
    for et in edge_types:
        p = params[et]
        w = jnp.zeros((2 * c_pad, h_pad), jnp.float32)
        w = w.at[:p['w_l'].shape[0], :hidden].set(p['w_l'])
        w = w.at[c_pad:c_pad + p['w_r'].shape[0], :hidden].set(p['w_r'])
        w_list.append(w)
        b_list.append(jnp.zeros((1, h_pad), jnp.float32).at[0, :hidden].set(p['b']))
    return jnp.stack(w_list).astype(jnp.bfloat16), jnp.stack(b_list)


def build_masks(edge_types, offsets, counts, n_pad):
    masks, cnt = [], jnp.zeros((n_pad, 1), jnp.float32)
    for et in edge_types:
        dst = et[2]
        m = jnp.zeros((n_pad, 1), jnp.float32)
        m = m.at[offsets[dst]:offsets[dst] + counts[dst], :].set(1.0)
        masks.append(m)
        cnt = cnt + m
    inv_cnt = jnp.where(cnt > 0, 1.0 / jnp.maximum(cnt, 1.0), 0.0)
    return jnp.stack(masks), inv_cnt


def init_sage_params(key, in_src, in_dst, hidden):
    k1, k2, k3 = jax.random.split(key, 3)
    return {
        'w_l': 0.1 * jax.random.normal(k1, (in_src, hidden), jnp.float32),
        'w_r': 0.1 * jax.random.normal(k2, (in_dst, hidden), jnp.float32),
        'b':   0.1 * jax.random.normal(k3, (hidden,), jnp.float32),
    }


if __name__ == "__main__":
    hidden = 32
    out_channels = 3  # sentiment classes (only used by decode(), not forward())

    n = {'post': 8, 'comment': 16, 'user': 8}
    c = {'post': 16, 'comment': 24, 'user': 12}

    keys = jax.random.split(jax.random.PRNGKey(0), 8)
    x_dict = {
        'post':    jax.random.normal(keys[0], (n['post'],    c['post']),    jnp.float32),
        'comment': jax.random.normal(keys[1], (n['comment'], c['comment']), jnp.float32),
        'user':    jax.random.normal(keys[2], (n['user'],    c['user']),    jnp.float32),
    }

    E_pc, E_cu = 24, 20
    edge_index_dict = {
        ('post', 'has_comment', 'comment'): jnp.stack([
            jax.random.randint(keys[3], (E_pc,), 0, n['post']),
            jax.random.randint(keys[4], (E_pc,), 0, n['comment'])]),
        ('comment', 'authored_by', 'user'): jnp.stack([
            jax.random.randint(keys[5], (E_cu,), 0, n['comment']),
            jax.random.randint(keys[6], (E_cu,), 0, n['user'])]),
        ('post', 'self_loop', 'post'): jnp.stack([jnp.arange(n['post'])] * 2),
        ('comment', 'self_loop', 'comment'): jnp.stack([jnp.arange(n['comment'])] * 2),
        ('user', 'self_loop', 'user'): jnp.stack([jnp.arange(n['user'])] * 2),
    }

    # Global node ordering: post, comment, user
    offsets, off = {}, 0
    for t in NODE_TYPES:
        offsets[t] = off
        off += n[t]
    n_total = off
    n_pad = _round_up(n_total, SUB)
    c_pad = _round_up(max(c.values()), LANE)   # 128
    h_pad = _round_up(hidden, LANE)            # 128 -> lane-dense output

    # Parameters (deterministic)
    pkeys = jax.random.split(jax.random.PRNGKey(42), 2 * len(EDGE_TYPES))
    conv1_params, conv2_params = {}, {}
    for i, et in enumerate(EDGE_TYPES):
        src, _, dst = et
        conv1_params[et] = init_sage_params(pkeys[2 * i], c[src], c[dst], hidden)
        conv2_params[et] = init_sage_params(pkeys[2 * i + 1], hidden, hidden, hidden)

    # Pack everything into padded stacks once (plain-JAX glue, outside kernels)
    x_slab = pack_features(x_dict, offsets, n_pad, c_pad)
    a_stack = jnp.stack([
        build_global_adj(edge_index_dict[et], offsets[et[0]], offsets[et[2]], n_pad)
        for et in EDGE_TYPES]).astype(jnp.bfloat16)
    masks, inv_cnt = build_masks(EDGE_TYPES, offsets, n, n_pad)
    w1, b1 = pack_layer_params(conv1_params, EDGE_TYPES, c_pad, h_pad, hidden)
    w2, b2 = pack_layer_params(conv2_params, EDGE_TYPES, h_pad, h_pad, hidden)

    out_slab = hetero_gnn_forward(x_slab, a_stack, masks, inv_cnt, w1, b1, w2, b2)
    jax.block_until_ready(out_slab)

    out = {t: out_slab[offsets[t]:offsets[t] + n[t], :hidden] for t in NODE_TYPES}

    assert set(out.keys()) == {'post', 'comment', 'user'}
    assert out['post'].shape == (n['post'], hidden)
    assert out['comment'].shape == (n['comment'], hidden)
    assert out['user'].shape == (n['user'], hidden)
    print("KERNEL_OK")
</pallas_src>

<mosaic_0001>
module attributes {stable_mosaic.version = 11 : i64} {
  func.func @_hetero_layer_kernel(%arg0: i32, %arg1: i32, %arg2: memref<32x128xbf16, #tpu.memory_space<vmem>>, %arg3: memref<1x32x32xbf16, #tpu.memory_space<vmem>>, %arg4: memref<1x256x128xbf16, #tpu.memory_space<vmem>>, %arg5: memref<1x1x128xf32, #tpu.memory_space<vmem>>, %arg6: memref<1x32x1xf32, #tpu.memory_space<vmem>>, %arg7: memref<32x1xf32, #tpu.memory_space<vmem>>, %arg8: memref<32x128xbf16, #tpu.memory_space<vmem>>, %arg9: memref<32x128xf32, #tpu.memory_space<vmem>>) attributes {dimension_semantics = [#tpu.dimension_semantics<parallel>, #tpu.dimension_semantics<arbitrary>], iteration_bounds = array<i64: 1, 5>, scalar_prefetch = 0 : i64, scratch_operands = 1 : i64, tpu.core_type = #tpu.core_type<tc>, window_params = [{pipeline_mode = #tpu.pipeline_mode<synchronous>, transform_indices = @transform_0, window_bounds = array<i64: 32, 128>}, {transform_indices = @transform_1, window_bounds = array<i64: 1, 32, 32>}, {transform_indices = @transform_2, window_bounds = array<i64: 1, 256, 128>}, {transform_indices = @transform_3, window_bounds = array<i64: 1, 1, 128>}, {transform_indices = @transform_4, window_bounds = array<i64: 1, 32, 1>}, {transform_indices = @transform_5, window_bounds = array<i64: 32, 1>}, {transform_indices = @transform_6, window_bounds = array<i64: 32, 128>}]} {
    %c0_i32 = arith.constant 0 : i32
    %0 = arith.cmpi eq, %arg1, %c0_i32 : i32
    %1 = arith.extui %0 : i1 to i32
    %c0_i32_0 = arith.constant 0 : i32
    %2 = arith.cmpi ne, %1, %c0_i32_0 : i32
    scf.if %2 {
      %cst_21 = arith.constant 0.000000e+00 : f32
      %30 = vector.broadcast %cst_21 : f32 to vector<32x128xf32>
      %c0_22 = arith.constant 0 : index
      %c0_23 = arith.constant 0 : index
      %31 = vector.load %arg9[%c0_22, %c0_23] : memref<32x128xf32, #tpu.memory_space<vmem>>, vector<32x128xf32>
      tpu.vector_store %arg9[%c0_22, %c0_23], %30 {strides = array<i32>} : memref<32x128xf32, #tpu.memory_space<vmem>>, vector<32x128xf32>,
    } else {
    }
    %c32_i32 = arith.constant 32 : i32
    %3 = arith.muli %arg0, %c32_i32 : i32
    %4 = tpu.assume_multiple %3, 32 : i32
    %c0 = arith.constant 0 : index
    %c0_1 = arith.constant 0 : index
    %5 = vector.load %arg2[%c0, %c0_1] : memref<32x128xbf16, #tpu.memory_space<vmem>>, vector<32x128xbf16>
    %6 = arith.index_cast %4 : i32 to index
    %c0_2 = arith.constant 0 : index
    %7 = vector.load %arg2[%6, %c0_2] : memref<32x128xbf16, #tpu.memory_space<vmem>>, vector<32x128xbf16>
    %c0_3 = arith.constant 0 : index
    %c0_4 = arith.constant 0 : index
    %c0_5 = arith.constant 0 : index
    %8 = vector.load %arg3[%c0_3, %c0_4, %c0_5] : memref<1x32x32xbf16, #tpu.memory_space<vmem>>, vector<1x32x32xbf16>
    %9 = vector.shape_cast %8 : vector<1x32x32xbf16> to vector<32x32xbf16>
    %cst = arith.constant dense<0.000000e+00> : vector<32x128xf32>
    %10 = tpu.matmul %9, %5, %cst {dimension_numbers = #tpu.dot_dimension_numbers<[1], [0], [0], [1], [0, 0, 1, 1], [], []>} : vector<32x32xbf16>, vector<32x128xbf16>, vector<32x128xf32> -> vector<32x128xf32>
    %11 = arith.truncf %10 : vector<32x128xf32> to vector<32x128xbf16>
    %12 = tpu.concatenate %11, %7 in 1 : vector<32x128xbf16>, vector<32x128xbf16> -> vector<32x256xbf16>
    %c0_6 = arith.constant 0 : index
    %c0_7 = arith.constant 0 : index
    %c0_8 = arith.constant 0 : index
    %13 = vector.load %arg4[%c0_6, %c0_7, %c0_8] : memref<1x256x128xbf16, #tpu.memory_space<vmem>>, vector<1x256x128xbf16>
    %14 = vector.shape_cast %13 : vector<1x256x128xbf16> to vector<256x128xbf16>
    %cst_9 = arith.constant dense<0.000000e+00> : vector<32x128xf32>
    %15 = tpu.matmul %12, %14, %cst_9 {dimension_numbers = #tpu.dot_dimension_numbers<[1], [0], [0], [1], [0, 0, 1, 1], [], []>} : vector<32x256xbf16>, vector<256x128xbf16>, vector<32x128xf32> -> vector<32x128xf32>
    %c0_10 = arith.constant 0 : index
    %c0_11 = arith.constant 0 : index
    %16 = vector.load %arg9[%c0_10, %c0_11] : memref<32x128xf32, #tpu.memory_space<vmem>>, vector<32x128xf32>
    %c0_12 = arith.constant 0 : index
    %c0_13 = arith.constant 0 : index
    %c0_14 = arith.constant 0 : index
    %17 = vector.load %arg6[%c0_12, %c0_13, %c0_14] : memref<1x32x1xf32, #tpu.memory_space<vmem>>, vector<1x32x1xf32>
    %18 = vector.shape_cast %17 : vector<1x32x1xf32> to vector<32x1xf32>
    %c0_15 = arith.constant 0 : index
    %c0_16 = arith.constant 0 : index
    %c0_17 = arith.constant 0 : index
    %19 = vector.load %arg5[%c0_15, %c0_16, %c0_17] : memref<1x1x128xf32, #tpu.memory_space<vmem>>, vector<1x1x128xf32>
    %20 = vector.shape_cast %19 : vector<1x1x128xf32> to vector<1x128xf32>
    %21 = vector.broadcast %20 : vector<1x128xf32> to vector<32x128xf32>
    %22 = arith.addf %15, %21 : vector<32x128xf32>
    %23 = vector.broadcast %18 : vector<32x1xf32> to vector<32x128xf32>
    %24 = arith.mulf %23, %22 : vector<32x128xf32>
    %25 = arith.addf %16, %24 : vector<32x128xf32>
    %c0_18 = arith.constant 0 : index
    %c0_19 = arith.constant 0 : index
    %26 = vector.load %arg9[%c0_18, %c0_19] : memref<32x128xf32, #tpu.memory_space<vmem>>, vector<32x128xf32>
    tpu.vector_store %arg9[%c0_18, %c0_19], %25 {strides = array<i32>} : memref<32x128xf32, #tpu.memory_space<vmem>>, vector<32x128xf32>,
    %c4_i32 = arith.constant 4 : i32
    %27 = arith.cmpi eq, %arg1, %c4_i32 : i32
    %28 = arith.extui %27 : i1 to i32
    %c0_i32_20 = arith.constant 0 : i32
    %29 = arith.cmpi ne, %28, %c0_i32_20 : i32
    scf.if %29 {
      %c0_21 = arith.constant 0 : index
      %c0_22 = arith.constant 0 : index
      %30 = vector.load %arg9[%c0_21, %c0_22] : memref<32x128xf32, #tpu.memory_space<vmem>>, vector<32x128xf32>
      %c0_23 = arith.constant 0 : index
      %c0_24 = arith.constant 0 : index
      %31 = vector.load %arg7[%c0_23, %c0_24] : memref<32x1xf32, #tpu.memory_space<vmem>>, vector<32x1xf32>
      %32 = vector.broadcast %31 : vector<32x1xf32> to vector<32x128xf32>
      %33 = arith.mulf %30, %32 : vector<32x128xf32>
      %cst_25 = arith.constant 0.000000e+00 : f32
      %34 = vector.broadcast %cst_25 : f32 to vector<32x128xf32>
      %35 = arith.maximumf %33, %34 : vector<32x128xf32>
      %36 = arith.truncf %35 : vector<32x128xf32> to vector<32x128xbf16>
      %c0_26 = arith.constant 0 : index
      %c0_27 = arith.constant 0 : index
      %37 = vector.load %arg8[%c0_26, %c0_27] : memref<32x128xbf16, #tpu.memory_space<vmem>>, vector<32x128xbf16>
      tpu.vector_store %arg8[%c0_26, %c0_27], %36 {strides = array<i32>} : memref<32x128xbf16, #tpu.memory_space<vmem>>, vector<32x128xbf16>,
    } else {
    }
    return
  }
  func.func @transform_0(%arg0: i32, %arg1: i32) -> (i32, i32) {
    %c0_i32 = arith.constant 0 : i32
    %c0_i32_0 = arith.constant 0 : i32
    %c0_i32_1 = arith.constant 0 : i32
    return %c0_i32, %c0_i32_0 : i32, i32
  }
  func.func @transform_1(%arg0: i32, %arg1: i32) -> (i32, i32, i32) {
    %c0_i32 = arith.constant 0 : i32
    %c0_i32_0 = arith.constant 0 : i32
    return %arg1, %arg0, %c0_i32 : i32, i32, i32
  }
  func.func @transform_2(%arg0: i32, %arg1: i32) -> (i32, i32, i32) {
    %c0_i32 = arith.constant 0 : i32
    %c0_i32_0 = arith.constant 0 : i32
    %c0_i32_1 = arith.constant 0 : i32
    return %arg1, %c0_i32, %c0_i32_0 : i32, i32, i32
  }
  func.func @transform_3(%arg0: i32, %arg1: i32) -> (i32, i32, i32) {
    %c0_i32 = arith.constant 0 : i32
    %c0_i32_0 = arith.constant 0 : i32
    %c0_i32_1 = arith.constant 0 : i32
    return %arg1, %c0_i32, %c0_i32_0 : i32, i32, i32
  }
  func.func @transform_4(%arg0: i32, %arg1: i32) -> (i32, i32, i32) {
    %c0_i32 = arith.constant 0 : i32
    %c0_i32_0 = arith.constant 0 : i32
    return %arg1, %arg0, %c0_i32 : i32, i32, i32
  }
  func.func @transform_5(%arg0: i32, %arg1: i32) -> (i32, i32) {
    %c0_i32 = arith.constant 0 : i32
    %c0_i32_0 = arith.constant 0 : i32
    return %arg0, %c0_i32 : i32, i32
  }
  func.func @transform_6(%arg0: i32, %arg1: i32) -> (i32, i32) {
    %c0_i32 = arith.constant 0 : i32
    %c0_i32_0 = arith.constant 0 : i32
    return %arg0, %c0_i32 : i32, i32
  }
}

</mosaic_0001>

<bundles_post_ra>
// kernel: tpu_custom_call.1
= control target key start
LH: loop header
LB: loop body
LE: loop exit
PB: predicated region body
PF: predicated region fallthrough
CT: control target
= control target key end

     0   :  { %11 = vsyncpa [#allocation4], 0  ;;  %s1442_s0 = inlined_call_operand.vmem [shape: bf16[32,128], index: 0, kind: input, shape index: {}]   ;;  %s1443_s1 = inlined_call_operand.vmem [shape: bf16[5,32,32], index: 1, kind: input, shape index: {}]   ;;  %s1444_s2 = inlined_call_operand.hbm [shape: bf16[5,256,128], index: 2, kind: input, shape index: {}]   ;;  %s1445_s3 = inlined_call_operand.vmem [shape: f32[5,1,128], index: 3, kind: input, shape index: {}]   ;;  %s1446_s4 = inlined_call_operand.vmem [shape: f32[5,32,1], index: 4, kind: input, shape index: {}]   ;;  %s1447_s5 = inlined_call_operand.vmem [shape: f32[32,1], index: 5, kind: input, shape index: {}]   ;;  %s1448_s6 = inlined_call_operand.hbm [shape: bf16[32,128], index: 6, kind: output, shape index: {}]  }
   0x1   :  { %13 = vsyncpa [#allocation4 + $0x1], 0 }
   0x2   :  { %14 = vsyncpa [#allocation5], 0  ;;  %s1275_s21 = smov 0   ;;  %s1277_s22 = smov 0  }
   0x3   :  { %s1279_s23 = smov 0   ;;  %s1281_s24 = smov 0  }
   0x4   :  { %s1283_s25 = smov 0   ;;  %s1285_s26 = smov 0  }
   0x5 LB: > { %s883_s27 = sadd.s32 4294967295, %s1230_s26   ;;  %s29_s28 = sadd.s32 1, %s1226_s25  ;;  %s1230_s26 = sphi %s1285_s26, %s20_s26   ;;  %s1226_s25 = sphi %s1283_s25, %s1455_s25   ;;  %s1222_s24 = sphi %s1281_s24, %s1454_s24   ;;  %s1218_s23 = sphi %s1279_s23, %s1453_s23   ;;  %s1214_s22 = sphi %s1277_s22, %s1452_s22   ;;  %s1210_s21 = sphi %s1275_s21, %s1451_s21  }
   0x6   : > { %p30_p0 = scmp.ge.s32.totalorder %s29_s28, 5  ;;  %s88_s29 = sadd.s32 1, %s1218_s23 }
   0x7   : > { %p95_p1 = scmp.ne.s32.totalorder %s1218_s23, %s1214_s22  ;;  %p96_p2 = scmp.eq.s32.totalorder %s1230_s26, 0 }
   0x8   : > { %s1457_s28 = smov (%p30_p0, %s29_s28), 0  ;;  %p101_p4 = scmp.ne.s32.totalorder %s1214_s22, %s1210_s21 }
   0x9   : > { %p1311_p3 = por %p96_p2, %p95_p1  ;;  %s85_s7 = ssub.s32 %s1226_s25, %s1457_s28 }
   0xa   : > { %p102_p5 = scmp.eq.s32.totalorder %s883_s27, 0  ;;  %p86_p6 = scmp.eq.s32.totalorder %s85_s7, 0 }
   0xb   : > { %p1054_p8 = scmp.lt.s32.totalorder %s1230_s26, 5  ;;  %s256_s10 = sand.u32 1, %s1218_s23  }
   0xc   : > { %p1320_p7 = por %p102_p5, %p101_p4  ;;  %s992_s11 = sshll.u32 %s1226_s25, 7 }
   0xd   : > { %s1326_s9 = scalar_select %p86_p6, %s1218_s23, %s88_s29  }
   0xe   : > { %s887_s12 = sshll.u32 %s256_s10, 7  ;;  %s265_s15 = scalar_lea.hbm %s1444_s2, %s992_s11 }
   0xf   : > { %s266_s16 = sshll.u32 %s265_s15, 4  ;;  %s260_s17 = scalar_lea.vmem [#allocation3], %s887_s12  ;;  %s267_s16 = int_to_ptr.hbm [resolvable:$true] %s266_s16 }
  0x10   : > { %s268_s18 = sshll.u32 %s260_s17, 4  ;;  %p1051_p9 = pnand %p1054_p8, %p1311_p3  ;;  %s269_s18 = int_to_ptr.vmem [resolvable:$true] %s268_s18 }
  0x11   : > { %p890_p10 = scmp.ge.s32.totalorder %s1230_s26, 1  ;;  %p295_p11 = scmp.lt.s32.totalorder %s1230_s26, 6 }
  0x12   : > { %s257_s19 = scalar_lea.sflag [#allocation4], %s256_s10  ;;  %s1232_s20 = smov 64  }
  0x13   : > { %s1233_s21 = smov 4   ;;  %p296_p12 = pnand %p890_p10, %p295_p11 }
  0x14   : > { %1053 = dma.hbm_to_vmem [thread:$0]  (!%p1051_p9), %s267_s16, 2048, %s269_s18, %s257_s19, %s1232_s20, %s1232_s20, %s1233_s21  }
  0x15   : > { %299 = sbr.rel (%p296_p12) target bundleno = 492 (0x1ec), region = 44  ;;  %s301_s29 = sand.u32 (!%p296_p12), 1, %s1214_s22  }
  0x16   : > { %s891_s7 = sshll.u32 (!%p296_p12), %s301_s29, 7  ;;  %s302_s11 = scalar_lea.sflag (!%p296_p12), [#allocation4], %s301_s29 }
  0x17   : > { %s1338_s13 = scalar_lea.vmem (!%p296_p12), [#allocation3], %s891_s7 }
  0x1a   : > { %1201 = dma.done.wait (%p1320_p7), %s302_s11, 2048  }
  0x1b   : > { %1203 = vsyncadd (%p1320_p7), %s302_s11, 4294965248  ;;  %p357_p13 = scmp.lt.s32.totalorder %s1222_s24, 4  ;;  %p896_p0 = scmp.ne.s32.totalorder %s1222_s24, 0 }
  0x1d   : > { %s1346_s30 = scalar_select %p357_p13, %s1222_s24, 4 }
  0x1e   : > { %390 = sbr.rel (%p896_p0) target bundleno = 40 (0x28), region = 52 }
  0x1f   : > { %s993_s10 = sshll.u32 %s1346_s30, 4  ;;  %s368_s15 = scalar_lea.vmem %s1445_s3, %s1346_s30 }
  0x20   : > { %s1356_s18 = scalar_lea.vmem %s1443_s1, %s993_s10  ;;  %s994_s8 = sshll.u32 %s1346_s30, 5 }
  0x21   : > { %s1362_s21 = scalar_lea.vmem %s1446_s4, %s994_s8 }
  0x23   : > { %v1234_v0 = vmov 0.0  }
  0x24   : > { %391 = vst [vmem:[#allocation2 + $0x10] sm:$0xff] %v1234_v0 }
  0x25   : > { %392 = vst [vmem:[#allocation2] sm:$0xff] %v1234_v0 }
  0x26   : > { %393 = vst [vmem:[#allocation2 + $0x18] sm:$0xff] %v1234_v0 }
  0x27   : > { %394 = vst [vmem:[#allocation2 + $0x8] sm:$0xff] %v1234_v0 }
  0x28 PF: > { %v996_v1 = vld [vmem:[%s1442_s0 + $0x8] sm:$0xff]  ;;  %v1008_v2 = vld [vmem:[%s1338_s13 + $0x38] sm:$0xff]  ;;  %v995_v4 = vld [vmem:[%s1442_s0] sm:$0xff]  ;;  %vm434_vm0 = vcmask 261120   ;;  %v1235_v24 = vmov 0   ;;  %p987_p1 = scmp.ne.s32.totalorder %s1222_s24, 4 }
  0x29   : > { %v1016_v3 = vld [vmem:[%s1338_s13 + $0x78] sm:$0xff]  ;;  %447 = vmatpush.bf16.msra.mxu0 %v996_v1  ;;  %628 = vmatpush.bf16.msra.mxu1 %v1008_v2  ;;  %v1007_v5 = vld [vmem:[%s1338_s13 + $0x30] sm:$0xff]  ;;  %v999_v6 = vld [vmem:[%s1356_s18] sm:$0xff] }
  0x2a   : > { %1036 = vmatpush.bf16.msra.mxu2 %v1016_v3  ;;  %1028 = vmatpush.bf16.msra.mxu3 %v1008_v2  ;;  %v1015_v7 = vld [vmem:[%s1338_s13 + $0x70] sm:$0xff]  ;;  %v1006_v8 = vld [vmem:[%s1338_s13 + $0x28] sm:$0xff]  ;;  %v1005_v10 = vld [vmem:[%s1338_s13 + $0x20] sm:$0xff] }
  0x2b   : > { %v1014_v9 = vld [vmem:[%s1338_s13 + $0x68] sm:$0xff]  ;;  %v1013_v11 = vld [vmem:[%s1338_s13 + $0x60] sm:$0xff]  ;;  %v1004_v13 = vld [vmem:[%s1338_s13 + $0x18] sm:$0xff]  ;;  %1113 = vset.pattern.permute.xlu0 %v1235_v24  ;;  %1114 = vset.pattern.permute.xlu1 %v1235_v24 }
  0x2c   : > { %v1000_v12 = vld [vmem:[%s1356_s18 + $0x8] sm:$0xff]  ;;  %v1012_v14 = vld [vmem:[%s1338_s13 + $0x58] sm:$0xff]  ;;  %v1003_v15 = vld [vmem:[%s1338_s13 + $0x10] sm:$0xff] }
  0x2d   : > { %448 = vmatpush.bf16.msra.mxu0 %v995_v4  ;;  %629 = vmatpush.bf16.msra.mxu1 %v1007_v5  ;;  %v1011_v16 = vld [vmem:[%s1338_s13 + $0x50] sm:$0xff]  ;;  %v1002_v17 = vld [vmem:[%s1338_s13 + $0x8] sm:$0xff]  ;;  %v1001_v19 = vld [vmem:[%s1338_s13] sm:$0xff] }
  0x2e   : > { %1037 = vmatpush.bf16.msra.mxu2 %v1015_v7  ;;  %1029 = vmatpush.bf16.msra.mxu3 %v1007_v5  ;;  %v1010_v18 = vld [vmem:[%s1338_s13 + $0x48] sm:$0xff]  ;;  %v1009_v20 = vld [vmem:[%s1338_s13 + $0x40] sm:$0xff]  ;;  %v526_v25 = vld [vmem:[%s1362_s21 + $0x10] sm:$0xff] }
  0x2f   : > { %v997_v21 = vld [vmem:[%s1442_s0] sm:$0xff]  ;;  %v998_v22 = vld [vmem:[%s1442_s0 + $0x8] sm:$0xff]  ;;  %678 = vperm.xlu1 %1114, %v526_v25   ;;  %v527_v28 = vld [vmem:[%s1362_s21 + $0x18] sm:$0xff] }
  0x30   : > { %913 = vmatmul.msk.bf16.vlgmr.msra.gmra.mxu0 %vm434_vm0, %v999_v6  ;;  %v524_v23 = vld [vmem:[%s1362_s21] sm:$0xff]  ;;  %v525_v27 = vld [vmem:[%s1362_s21 + $0x8] sm:$0xff]  ;;  %v520_v48 = vld [vmem:[#allocation2 + $0x10] sm:$0xff] }
  0x31   : > { %647 = vmatpush.bf16.msrb.mxu0 %v1016_v3  ;;  %630 = vmatpush.bf16.msra.mxu1 %v1006_v8  ;;  %v1115_v42 = vld [vmem:[%s368_s15] ss:$0 sm:$0xff]  ;;  %v522_v0 = vld [vmem:[#allocation2 + $0x18] sm:$0xff] }
  0x32   : > { %1038 = vmatpush.bf16.msra.mxu2 %v1014_v9  ;;  %1030 = vmatpush.bf16.msra.mxu3 %v1006_v8  ;;  %v521_v56 = vld [vmem:[#allocation2] sm:$0xff]  ;;  %v523_v8 = vld [vmem:[#allocation2 + $0x8] sm:$0xff] }
  0x33   : > { %668 = vperm.xlu0 %1113, %v524_v23  }
  0x35   : > { %648 = vmatpush.bf16.msrb.mxu0 %v1015_v7  ;;  %631 = vmatpush.bf16.msra.mxu1 %v1005_v10 }
  0x36   : > { %1039 = vmatpush.bf16.msra.mxu2 %v1013_v11  ;;  %1031 = vmatpush.bf16.msra.mxu3 %v1005_v10 }
  0x37   : > { %683 = vperm.xlu1 %1114, %v527_v28  }
  0x39   : > { %649 = vmatpush.bf16.msrb.mxu0 %v1014_v9  ;;  %632 = vmatpush.bf16.msra.mxu1 %v1004_v13 }
  0x3a   : > { %1032 = vmatpush.bf16.msra.mxu3 %v1004_v13  ;;  %1040 = vmatpush.bf16.msra.mxu2 %v1012_v14 }
  0x3b   : > { %673 = vperm.xlu0 %1113, %v525_v27  }
  0x3d   : > { %650 = vmatpush.bf16.msrb.mxu0 %v1013_v11  ;;  %633 = vmatpush.bf16.msra.mxu1 %v1003_v15 }
  0x3e   : > { %1033 = vmatpush.bf16.msra.mxu3 %v1003_v15  ;;  %1041 = vmatpush.bf16.msra.mxu2 %v1011_v16 }
  0x40   : > { %914 = vmatmul.msk.bf16.gmra.mxu0 %vm434_vm0, %v1000_v12 }
  0x41   : > { %651 = vmatpush.bf16.msrb.mxu0 %v1012_v14  ;;  %634 = vmatpush.bf16.msra.mxu1 %v1002_v17 }
  0x42   : > { %1034 = vmatpush.bf16.msra.mxu3 %v1002_v17  ;;  %1042 = vmatpush.bf16.msra.mxu2 %v1010_v18 }
  0x45   : > { %652 = vmatpush.bf16.msrb.mxu0 %v1011_v16  ;;  %635 = vmatpush.bf16.msra.mxu1 %v1001_v19 }
  0x46   : > { %1035 = vmatpush.bf16.msra.mxu3 %v1001_v19  ;;  %1043 = vmatpush.bf16.msra.mxu2 %v1009_v20 }
  0x49   : > { %653 = vmatpush.bf16.msrb.mxu0 %v1010_v18  ;;  %660 = vmatmul.bf16.vlgmr.msra.gmra.mxu2 %v998_v22 }
  0x4d   : > { %654 = vmatpush.bf16.msrb.mxu0 %v1009_v20 }
  0x50   : > { %655 = vmatmul.bf16.vlgmr.msrb.gmra.mxu0 %v997_v21 }
  0xa1   : > { %v679_v62 = vpop.permute.xlu1 %678 }
  0xa5   : > { %v669_v45 = vpop.permute.xlu0 %668 }
  0xa9   : > { %v684_v7 = vpop.permute.xlu1 %683 }
  0xad   : > { %v450_v26 = vpop.f32.mrf.mxu0  ;;  %v674_v54 = vpop.permute.xlu0 %673 }
  0xae   : > { %v460_v29 = vpack.c.bf16 %v450_v26, %v450_v26 }
  0xb0   : > { %v468_v32 = vunpack.c.l.b16 %v460_v29 }
  0xb5   : > { %v452_v30 = vpop.f32.mrf.mxu0 }
  0xb6   : > { %v461_v31 = vpack.c.bf16 %v452_v30, %v452_v30 }
  0xb8   : > { %v469_v33 = vunpack.c.l.b16 %v461_v31 }
  0xba   : > { %v472_v34 = vpack.c.b16 %v469_v33, %v468_v32 }
  0xbc   : > { %636 = vmatmul.bf16.vlgmr.msra.gmra.mxu1 %v472_v34 }
  0xbd   : > { %v455_v35 = vpop.f32.mrf.mxu0 }
  0xbe   : > { %v462_v36 = vpack.c.bf16 %v455_v35, %v455_v35 }
  0xc0   : > { %v470_v39 = vunpack.c.l.b16 %v462_v36 }
  0xc5   : > { %v457_v37 = vpop.f32.mrf.mxu0 }
  0xc6   : > { %v463_v38 = vpack.c.bf16 %v457_v37, %v457_v37 }
  0xc8   : > { %v471_v40 = vunpack.c.l.b16 %v463_v38 }
  0xca   : > { %v473_v41 = vpack.c.b16 %v471_v40, %v470_v39 }
  0xcc   : > { %641 = vmatmul.bf16.vlgmr.msra.gmra.mxu3 %v473_v41  ;;  %v661_v59 = vpop.f32.mrf.mxu2 }
  0xcd   : > { %v656_v43 = vpop.f32.mrf.mxu0 }
  0xd4   : > { %v663_v5 = vpop.f32.mrf.mxu2 }
  0xd5   : > { %v658_v52 = vpop.f32.mrf.mxu0 }
 0x139   : > { %v637_v44 = vpop.f32.mrf.mxu1 }
 0x13a   : > { %v638_v46 = vadd.f32 %v1115_v42, %v637_v44 }
 0x13c   : > { %v657_v47 = vadd.f32 %v656_v43, %v638_v46 }
 0x13e   : > { %v686_v49 = vmul.f32 %v669_v45, %v657_v47 }
 0x140   : > { %v690_v50 = vadd.f32 %v686_v49, %v520_v48 }
 0x141   : > { %v639_v51 = vpop.f32.mrf.mxu1 }
 0x142   : > { %694 = vst [vmem:[#allocation2 + $0x10] sm:$0xff] %v690_v50  ;;  %v640_v53 = vadd.f32 %v1115_v42, %v639_v51 }
 0x144   : > { %v659_v55 = vadd.f32 %v658_v52, %v640_v53 }
 0x146   : > { %v687_v57 = vmul.f32 %v674_v54, %v659_v55 }
 0x148   : > { %v691_v58 = vadd.f32 %v687_v57, %v521_v56 }
 0x14a   : > { %695 = vst [vmem:[#allocation2] sm:$0xff] %v691_v58 }
 0x14f   : > { %v642_v60 = vpop.f32.mrf.mxu3 }
 0x150   : > { %v643_v61 = vadd.f32 %v1115_v42, %v642_v60 }
 0x152   : > { %v662_v63 = vadd.f32 %v661_v59, %v643_v61 }
 0x154   : > { %v688_v1 = vmul.f32 %v679_v62, %v662_v63 }
 0x156   : > { %v692_v2 = vadd.f32 %v688_v1, %v522_v0 }
 0x157   : > { %v644_v3 = vpop.f32.mrf.mxu3 }
 0x158   : > { %696 = vst [vmem:[#allocation2 + $0x18] sm:$0xff] %v692_v2  ;;  %v645_v4 = vadd.f32 %v1115_v42, %v644_v3 }
 0x15a   : > { %v664_v6 = vadd.f32 %v663_v5, %v645_v4 }
 0x15c   : > { %v689_v9 = vmul.f32 %v684_v7, %v664_v6  ;;  %701 = sbr.rel (%p987_p1) target bundleno = 486 (0x1e6), region = 56 }
 0x15e   : > { %v693_v10 = vadd.f32 %v689_v9, %v523_v8 }
 0x160   : > { %697 = vst [vmem:[#allocation2 + $0x8] sm:$0xff] %v693_v10 }
 0x161   : > { %v708_v11 = vld [vmem:[%s1447_s5 + $0x10] sm:$0xff]  ;;  %v706_v12 = vld [vmem:[%s1447_s5] sm:$0xff]  ;;  %v1236_v13 = vmov 0   ;;  %v709_v14 = vld [vmem:[%s1447_s5 + $0x18] sm:$0xff] }
 0x162   : > { %1117 = vset.pattern.permute.xlu1 %v1236_v13  ;;  %1116 = vset.pattern.permute.xlu0 %v1236_v13  ;;  %v707_v15 = vld [vmem:[%s1447_s5 + $0x8] sm:$0xff]  ;;  %v704_v18 = vld [vmem:[#allocation2 + $0x18] sm:$0xff]  ;;  %v702_v19 = vld [vmem:[#allocation2 + $0x10] sm:$0xff] }
 0x163   : > { %722 = vperm.xlu1 %1117, %v708_v11   ;;  %712 = vperm.xlu0 %1116, %v706_v12   ;;  %v703_v21 = vld [vmem:[#allocation2] sm:$0xff] }
 0x167   : > { %v705_v20 = vld [vmem:[#allocation2 + $0x8] sm:$0xff] }
 0x16b   : > { %727 = vperm.xlu1 %1117, %v709_v14   ;;  %717 = vperm.xlu0 %1116, %v707_v15  }
 0x1d5   : > { %v723_v16 = vpop.permute.xlu1 %722  ;;  %v713_v17 = vpop.permute.xlu0 %712 }
 0x1d6   : > { %v732_v22 = vmul.f32 %v723_v16, %v704_v18  ;;  %v730_v23 = vmul.f32 %v713_v17, %v702_v19 }
 0x1d8   : > { %v736_v28 = vmax.f32 %v732_v22, 0.0  ;;  %v734_v29 = vmax.f32 %v730_v23, 0.0 }
 0x1dd   : > { %v728_v24 = vpop.permute.xlu1 %727  ;;  %v718_v25 = vpop.permute.xlu0 %717 }
 0x1de   : > { %v733_v26 = vmul.f32 %v728_v24, %v705_v20  ;;  %v731_v27 = vmul.f32 %v718_v25, %v703_v21 }
 0x1e0   : > { %v737_v30 = vmax.f32 %v733_v26, 0.0  ;;  %v735_v31 = vmax.f32 %v731_v27, 0.0 }
 0x1e2   : > { %v1025_v32 = vpack.c.bf16 %v737_v30, %v736_v28  ;;  %v1020_v33 = vpack.c.bf16 %v735_v31, %v734_v29 }
 0x1e4   : > { %1027 = vst [vmem:[#allocation6 + $0x8] sm:$0xff] %v1025_v32  }
 0x1e5   : > { %1021 = vst [vmem:[#allocation6] sm:$0xff] %v1020_v33  }
 0x1e6 PF: > { %p1055_p2 = scmp.eq.s32.totalorder %s883_s27, 4  ;;  %s756_s10 = sshll.u32 %s1448_s6, 4  ;;  %s757_s10 = int_to_ptr.hbm [resolvable:$true] %s756_s10 }
 0x1e7   : > { %s1237_s12 = smov [#allocation6]   ;;  %s1238_s16 = smov 64  }
 0x1e8   : > { %s754_s14 = sshll.u32 %s1237_s12, 4  ;;  %s1239_s17 = smov 4   ;;  %s755_s14 = int_to_ptr.vmem [resolvable:$true] %s754_s14 }
 0x1e9   : > { %1047 = dma.vmem_to_hbm [thread:$0]  (%p1055_p2), %s755_s14, 256, %s757_s10, [#allocation5], %s1238_s16, %s1238_s16, %s1239_s17  }
 0x1ea   : > { %1205 = dma.done.wait (%p1055_p2), [#allocation5], 256  }
 0x1eb   : > { %1207 = vsyncadd (%p1055_p2), [#allocation5], 4294967040 }
 0x1ec PF: > { %s20_s26 = sadd.s32 1, %s1230_s26   ;;  %s1451_s21 = smov %s1214_s22 }
 0x1ed   : > { %p17_p3 = scmp.ge.s32.totalorder %s20_s26, 7   ;;  %s1452_s22 = smov %s1218_s23 }
 0x1ee   : > { %s1453_s23 = smov %s1326_s9  ;;  %s1454_s24 = smov %s1226_s25 }
 0x1ef   : > { %s1455_s25 = smov %s1457_s28  ;;  %19 = sbr.rel (!%p17_p3) target bundleno = 5 (0x5), region = 103 }
 0x1f4   :  { %773 = vsyncpa [#allocation4], 1 }
 0x1f5   :  { %775 = vsyncpa [#allocation4 + $0x1], 1 }
 0x1f6   :  { %776 = vsyncpa [#allocation5], 1 }
 0x1f7   :  { %778 = vsyncpa [#allocation5 + $0x1], 1 }

</bundles_post_ra>
